<compile_context>
chip_gen: v6e
topology: v6e:2x2x1
jax: 0.10.0
libtpu: 0.0.40
codegen_flags: <defaults>
</compile_context>

<pallas_src>
import jax
import jax.numpy as jnp
from jax.experimental import pallas as pl
from jax.experimental.pallas import tpu as pltpu

_NEG_SENTINEL = -1e30  # plain Python float: never captured as a traced constant


def bertpool_kernel(enc_ref, bias_ref, wh_ref, wt_ref, b_ref, logits_ref,
                    head_acc, tail_acc):
    seq_id = pl.program_id(1)

    @pl.when(seq_id == 0)
    def _init():
        head_acc[...] = jnp.full_like(head_acc, _NEG_SENTINEL)
        tail_acc[...] = jnp.full_like(tail_acc, _NEG_SENTINEL)

    # [tb, ts, H] encoder tile; upcast keeps VPU math in f32 (required on v5e
    # even when streaming bf16 from HBM).
    enc = enc_ref[...].astype(jnp.float32)
    bias = bias_ref[...].astype(jnp.float32)         # [tb, ts, 2]: 0 / -1e30
    hbias = bias[:, :, 0:1]                          # [tb, ts, 1]
    tbias = bias[:, :, 1:2]                          # [tb, ts, 1]

    # Masked max over the sequence tile, folded into the running accumulators.
    head_acc[...] = jnp.maximum(head_acc[...], jnp.max(enc + hbias, axis=1))
    tail_acc[...] = jnp.maximum(tail_acc[...], jnp.max(enc + tbias, axis=1))

    @pl.when(seq_id == pl.num_programs(1) - 1)
    def _finalize():
        # concat([head, tail], -1) @ W^T + b == head @ Wh + tail @ Wt + b
        logits = (
            jnp.dot(head_acc[...], wh_ref[...],
                    preferred_element_type=jnp.float32)
            + jnp.dot(tail_acc[...], wt_ref[...],
                      preferred_element_type=jnp.float32)
            + b_ref[...]
        )
        logits_ref[...] = logits.astype(logits_ref.dtype)


def _round_up(x, m):
    return ((x + m - 1) // m) * m


def _estimate_vmem_bytes(tb, ts, H, R, enc_itemsize):
    """VMEM working set for one (tb, ts) choice, including lane/sublane padding
    and double-buffering of every pipelined operand."""
    Hl = _round_up(H, 128)          # lane-padded hidden (enc / accumulator last dim)
    Rl = _round_up(R, 128)          # lane-padded relation vocab
    tbp = _round_up(tb, 8)
    tsp = _round_up(ts, 16)         # sublane padding (bf16 worst case)
    enc = 2 * tbp * tsp * Hl * enc_itemsize       # encoder tiles (x2 buffers)
    bias = 2 * tbp * tsp * 128 * 2                # merged bf16 mask bias, 2->128 lanes
    weights = 2 * 2 * _round_up(H, 8) * Rl * 4    # w_head + w_tail (x2 buffers)
    bvec = 2 * 8 * Rl * 4                         # linear bias row
    out = 2 * tbp * Rl * 4                        # logits output block
    scratch = 2 * tbp * Hl * 4                    # head/tail accumulators
    return enc + bias + weights + bvec + out + scratch


def _vmem_capacity_bytes():
    try:
        cap = int(pltpu.get_tpu_info().vmem_capacity_bytes)
        if cap > 0:
            return cap
    except Exception:
        pass
    return 64 * 1024 * 1024         # conservative default, legal on v5e/v6e/v7x


def _select_tiles(B, S, H, R, enc_itemsize, budget):
    """Co-select (tb, ts) against one per-kernel VMEM byte budget."""
    Bp = _round_up(max(B, 1), 8)
    Sp8 = _round_up(max(S, 1), 8)

    # Batch tile: prefer 8/16 so grid[0] >= 2 whenever possible (v7x megacore)
    # and the VMEM saved can be spent on a longer sequence tile.
    cands = [tb for tb in (8, 16) if Bp % tb == 0]
    multi = [tb for tb in cands if Bp // tb >= 2]
    if multi:
        cands = multi
    if not cands:
        cands = [Bp]

    best = None
    for tb in cands:
        fixed = _estimate_vmem_bytes(tb, 0, H, R, enc_itemsize)
        per_row = 2 * _round_up(tb, 8) * (_round_up(H, 128) * enc_itemsize
                                          + 128 * 2)
        avail = budget - fixed
        ts_cap = avail // per_row if avail > 0 else 8
        ts_cap = max(8, min(Sp8, (ts_cap // 8) * 8))
        # Balance sequence tiles so padding waste / last-tile imbalance is small.
        n_seq = -(-Sp8 // ts_cap)
        ts = _round_up(-(-Sp8 // n_seq), 8)
        # Prefer >=2 batch tiles, then larger per-step streamed bytes (cap ~8MiB
        # since bigger tiles stop helping), then the smaller batch tile.
        score = (min(Bp // tb, 2),
                 min(tb * ts * H * enc_itemsize, 8 << 20),
                 -tb)
        if best is None or score > best[0]:
            best = (score, tb, ts, n_seq)

    _, tb, ts, n_seq = best
    Sp = ts * n_seq
    return Bp, Sp, tb, ts


@jax.jit
def bert_pool_forward(encoder_output, head_index, tail_index, w, b):
    """encoder_output: [B,S,H]; head/tail_index: [B,S] i32; w: [2H,R] (=W^T); b: [1,R]."""
    B, S, H = encoder_output.shape
    R = w.shape[1]
    itemsize = jnp.dtype(encoder_output.dtype).itemsize

    cap = _vmem_capacity_bytes()
    budget = int(0.70 * cap)                      # tile-selection budget
    Bp, Sp, tb, ts = _select_tiles(B, S, H, R, itemsize, budget)

    # Pad batch / sequence to tile multiples; padded positions are fully masked
    # (index == 0 -> additive bias -1e30) and padded batch rows are dropped.
    if (Bp, Sp) != (B, S):
        encoder_output = jnp.pad(encoder_output,
                                 ((0, Bp - B), (0, Sp - S), (0, 0)))
        head_index = jnp.pad(head_index, ((0, Bp - B), (0, Sp - S)))
        tail_index = jnp.pad(tail_index, ((0, Bp - B), (0, Sp - S)))

    # Merged additive mask bias [Bp, Sp, 2] (lane 0 = head, lane 1 = tail) in
    # bf16: one DMA stream instead of two, 4x smaller after 2->128 lane padding.
    idx = jnp.stack([head_index, tail_index], axis=-1)
    mask_bias = jnp.where(idx == 0, _NEG_SENTINEL, 0.0).astype(jnp.bfloat16)

    # Pre-split weight: head half and tail half, each [H, R].
    w_head = w[:H, :]
    w_tail = w[H:, :]

    est = _estimate_vmem_bytes(tb, ts, H, R, itemsize)
    vmem_limit = int(min(max(32 << 20, int(est * 1.2)), int(0.85 * cap)))
    vmem_limit = max(vmem_limit, est)             # never clamp below the estimate

    grid = (Bp // tb, Sp // ts)

    logits = pl.pallas_call(
        bertpool_kernel,
        grid_spec=pltpu.PrefetchScalarGridSpec(
            num_scalar_prefetch=0,
            grid=grid,
            in_specs=[
                pl.BlockSpec((tb, ts, H), lambda bi, si: (bi, si, 0)),  # encoder
                pl.BlockSpec((tb, ts, 2), lambda bi, si: (bi, si, 0)),  # mask bias
                pl.BlockSpec((H, R), lambda bi, si: (0, 0)),            # w_head
                pl.BlockSpec((H, R), lambda bi, si: (0, 0)),            # w_tail
                pl.BlockSpec((1, R), lambda bi, si: (0, 0)),            # bias
            ],
            out_specs=pl.BlockSpec((tb, R), lambda bi, si: (bi, 0)),
            scratch_shapes=[
                pltpu.VMEM((tb, H), jnp.float32),   # running head max
                pltpu.VMEM((tb, H), jnp.float32),   # running tail max
            ],
        ),
        out_shape=jax.ShapeDtypeStruct((Bp, R), jnp.float32),
        compiler_params=pltpu.CompilerParams(
            dimension_semantics=("parallel", "arbitrary"),
            vmem_limit_bytes=vmem_limit,
        ),
    )(encoder_output, mask_bias, w_head, w_tail, b)

    logits = logits[:B]
    # Tiny argmax stays outside the kernel (keeps kernel output lane-dense).
    pred = jnp.argmax(logits, axis=-1).astype(jnp.int32)
    return logits, pred


def _reference(encoder_output, head_index, tail_index, w, b):
    def pool(x, idx):
        filled = jnp.where((idx == 0)[:, :, None], -jnp.inf,
                           x.astype(jnp.float32))
        return jnp.max(filled, axis=1)
    total = jnp.concatenate([pool(encoder_output, head_index),
                             pool(encoder_output, tail_index)], axis=-1)
    logits = total @ w + b
    return logits, jnp.argmax(logits, axis=-1).astype(jnp.int32)


if __name__ == "__main__":
    B, S, H, R, VOCAB = 2, 8, 32, 16, 50

    key = jax.random.PRNGKey(0)
    k_tok, k_emb, k_w, k_b, k_h, k_t = jax.random.split(key, 6)

    # Synthetic BERT inputs.
    bert_token = jax.random.randint(k_tok, (B, S), 1, VOCAB, dtype=jnp.int32)
    bert_attention_mask = jnp.ones((B, S), dtype=jnp.int32)

    # TODO(synk): stand-in for the pretrained BERT encoder output [B, S, H].
    emb_table = jax.random.normal(k_emb, (VOCAB, H), dtype=jnp.float32)
    encoder_output = emb_table[bert_token] * bert_attention_mask[:, :, None]

    # Head / tail entity index masks (binary, at least one active position each).
    head_index = (jax.random.uniform(k_h, (B, S)) > 0.6).astype(jnp.int32)
    tail_index = (jax.random.uniform(k_t, (B, S)) > 0.6).astype(jnp.int32)
    head_index = head_index.at[:, 0].set(1)
    tail_index = tail_index.at[:, -1].set(1)

    # Linear(2H -> R) parameters, stored as W^T [2H, R] and bias [1, R].
    w = jax.random.normal(k_w, (2 * H, R), dtype=jnp.float32) * 0.05
    b = jax.random.normal(k_b, (1, R), dtype=jnp.float32) * 0.05

    logits, pred = bert_pool_forward(encoder_output, head_index, tail_index, w, b)
    jax.block_until_ready((logits, pred))

    ref_logits, ref_pred = _reference(encoder_output, head_index, tail_index, w, b)
    assert jnp.allclose(logits, ref_logits, atol=1e-4), "logits mismatch"
    assert jnp.array_equal(pred, ref_pred), "pred mismatch"

    print("KERNEL_OK")
</pallas_src>

<mosaic_0001>
module attributes {stable_mosaic.version = 11 : i64} {
  func.func @bertpool_kernel(%arg0: i32, %arg1: i32, %arg2: memref<8x8x32xf32, #tpu.memory_space<vmem>>, %arg3: memref<8x8x2xbf16, #tpu.memory_space<vmem>>, %arg4: memref<32x16xf32, #tpu.memory_space<vmem>>, %arg5: memref<32x16xf32, #tpu.memory_space<vmem>>, %arg6: memref<1x16xf32, #tpu.memory_space<vmem>>, %arg7: memref<8x16xf32, #tpu.memory_space<vmem>>, %arg8: memref<8x32xf32, #tpu.memory_space<vmem>>, %arg9: memref<8x32xf32, #tpu.memory_space<vmem>>) attributes {dimension_semantics = [#tpu.dimension_semantics<parallel>, #tpu.dimension_semantics<arbitrary>], iteration_bounds = array<i64: 1, 1>, scalar_prefetch = 0 : i64, scratch_operands = 2 : i64, tpu.core_type = #tpu.core_type<tc>, window_params = [{transform_indices = @transform_0, window_bounds = array<i64: 8, 8, 32>}, {transform_indices = @transform_1, window_bounds = array<i64: 8, 8, 2>}, {pipeline_mode = #tpu.pipeline_mode<synchronous>, transform_indices = @transform_2, window_bounds = array<i64: 32, 16>}, {pipeline_mode = #tpu.pipeline_mode<synchronous>, transform_indices = @transform_3, window_bounds = array<i64: 32, 16>}, {pipeline_mode = #tpu.pipeline_mode<synchronous>, transform_indices = @transform_4, window_bounds = array<i64: 1, 16>}, {transform_indices = @transform_5, window_bounds = array<i64: 8, 16>}]} {
    %c0_i32 = arith.constant 0 : i32
    %0 = arith.cmpi eq, %arg1, %c0_i32 : i32
    %1 = arith.extui %0 : i1 to i32
    %c0_i32_0 = arith.constant 0 : i32
    %2 = arith.cmpi ne, %1, %c0_i32_0 : i32
    scf.if %2 {
      %cst_17 = arith.constant -1.000000e+30 : f32
      %23 = vector.broadcast %cst_17 : f32 to vector<8x32xf32>
      %c0_18 = arith.constant 0 : index
      %c0_19 = arith.constant 0 : index
      %24 = vector.load %arg8[%c0_18, %c0_19] : memref<8x32xf32, #tpu.memory_space<vmem>>, vector<8x32xf32>
      tpu.vector_store %arg8[%c0_18, %c0_19], %23 {strides = array<i32>} : memref<8x32xf32, #tpu.memory_space<vmem>>, vector<8x32xf32>,
      %cst_20 = arith.constant -1.000000e+30 : f32
      %25 = vector.broadcast %cst_20 : f32 to vector<8x32xf32>
      %c0_21 = arith.constant 0 : index
      %c0_22 = arith.constant 0 : index
      %26 = vector.load %arg9[%c0_21, %c0_22] : memref<8x32xf32, #tpu.memory_space<vmem>>, vector<8x32xf32>
      tpu.vector_store %arg9[%c0_21, %c0_22], %25 {strides = array<i32>} : memref<8x32xf32, #tpu.memory_space<vmem>>, vector<8x32xf32>,
    } else {
    }
    %c0 = arith.constant 0 : index
    %c0_1 = arith.constant 0 : index
    %c0_2 = arith.constant 0 : index
    %3 = vector.load %arg2[%c0, %c0_1, %c0_2] : memref<8x8x32xf32, #tpu.memory_space<vmem>>, vector<8x8x32xf32>
    %c0_3 = arith.constant 0 : index
    %c0_4 = arith.constant 0 : index
    %c0_5 = arith.constant 0 : index
    %4 = vector.load %arg3[%c0_3, %c0_4, %c0_5] : memref<8x8x2xbf16, #tpu.memory_space<vmem>>, vector<8x8x2xbf16>
    %5 = arith.extf %4 : vector<8x8x2xbf16> to vector<8x8x2xf32>
    %6 = vector.extract_strided_slice %5 {offsets = [0, 0, 0], sizes = [8, 8, 1], strides = [1, 1, 1]} : vector<8x8x2xf32> to vector<8x8x1xf32>
    %7 = vector.extract_strided_slice %5 {offsets = [0, 0, 1], sizes = [8, 8, 1], strides = [1, 1, 1]} : vector<8x8x2xf32> to vector<8x8x1xf32>
    %c0_6 = arith.constant 0 : index
    %c0_7 = arith.constant 0 : index
    %8 = vector.load %arg8[%c0_6, %c0_7] : memref<8x32xf32, #tpu.memory_space<vmem>>, vector<8x32xf32>
    %9 = vector.broadcast %6 : vector<8x8x1xf32> to vector<8x8x32xf32>
    %10 = arith.addf %3, %9 : vector<8x8x32xf32>
    %cst = arith.constant dense<0xFF800000> : vector<8x32xf32>
    %11 = vector.multi_reduction <maximumf>, %10, %cst [1] : vector<8x8x32xf32> to vector<8x32xf32>
    %12 = arith.maximumf %8, %11 : vector<8x32xf32>
    %c0_8 = arith.constant 0 : index
    %c0_9 = arith.constant 0 : index
    %13 = vector.load %arg8[%c0_8, %c0_9] : memref<8x32xf32, #tpu.memory_space<vmem>>, vector<8x32xf32>
    tpu.vector_store %arg8[%c0_8, %c0_9], %12 {strides = array<i32>} : memref<8x32xf32, #tpu.memory_space<vmem>>, vector<8x32xf32>,
    %c0_10 = arith.constant 0 : index
    %c0_11 = arith.constant 0 : index
    %14 = vector.load %arg9[%c0_10, %c0_11] : memref<8x32xf32, #tpu.memory_space<vmem>>, vector<8x32xf32>
    %15 = vector.broadcast %7 : vector<8x8x1xf32> to vector<8x8x32xf32>
    %16 = arith.addf %3, %15 : vector<8x8x32xf32>
    %cst_12 = arith.constant dense<0xFF800000> : vector<8x32xf32>
    %17 = vector.multi_reduction <maximumf>, %16, %cst_12 [1] : vector<8x8x32xf32> to vector<8x32xf32>
    %18 = arith.maximumf %14, %17 : vector<8x32xf32>
    %c0_13 = arith.constant 0 : index
    %c0_14 = arith.constant 0 : index
    %19 = vector.load %arg9[%c0_13, %c0_14] : memref<8x32xf32, #tpu.memory_space<vmem>>, vector<8x32xf32>
    tpu.vector_store %arg9[%c0_13, %c0_14], %18 {strides = array<i32>} : memref<8x32xf32, #tpu.memory_space<vmem>>, vector<8x32xf32>,
    %c0_i32_15 = arith.constant 0 : i32
    %20 = arith.cmpi eq, %arg1, %c0_i32_15 : i32
    %21 = arith.extui %20 : i1 to i32
    %c0_i32_16 = arith.constant 0 : i32
    %22 = arith.cmpi ne, %21, %c0_i32_16 : i32
    scf.if %22 {
      %c0_17 = arith.constant 0 : index
      %c0_18 = arith.constant 0 : index
      %23 = vector.load %arg8[%c0_17, %c0_18] : memref<8x32xf32, #tpu.memory_space<vmem>>, vector<8x32xf32>
      %c0_19 = arith.constant 0 : index
      %c0_20 = arith.constant 0 : index
      %24 = vector.load %arg4[%c0_19, %c0_20] : memref<32x16xf32, #tpu.memory_space<vmem>>, vector<32x16xf32>
      %cst_21 = arith.constant dense<0.000000e+00> : vector<8x16xf32>
      %25 = tpu.matmul %23, %24, %cst_21 {dimension_numbers = #tpu.dot_dimension_numbers<[1], [0], [0], [1], [0, 0, 1, 1], [], []>} : vector<8x32xf32>, vector<32x16xf32>, vector<8x16xf32> -> vector<8x16xf32>
      %c0_22 = arith.constant 0 : index
      %c0_23 = arith.constant 0 : index
      %26 = vector.load %arg9[%c0_22, %c0_23] : memref<8x32xf32, #tpu.memory_space<vmem>>, vector<8x32xf32>
      %c0_24 = arith.constant 0 : index
      %c0_25 = arith.constant 0 : index
      %27 = vector.load %arg5[%c0_24, %c0_25] : memref<32x16xf32, #tpu.memory_space<vmem>>, vector<32x16xf32>
      %cst_26 = arith.constant dense<0.000000e+00> : vector<8x16xf32>
      %28 = tpu.matmul %26, %27, %cst_26 {dimension_numbers = #tpu.dot_dimension_numbers<[1], [0], [0], [1], [0, 0, 1, 1], [], []>} : vector<8x32xf32>, vector<32x16xf32>, vector<8x16xf32> -> vector<8x16xf32>
      %29 = arith.addf %25, %28 : vector<8x16xf32>
      %c0_27 = arith.constant 0 : index
      %c0_28 = arith.constant 0 : index
      %30 = vector.load %arg6[%c0_27, %c0_28] : memref<1x16xf32, #tpu.memory_space<vmem>>, vector<1x16xf32>
      %31 = vector.broadcast %30 : vector<1x16xf32> to vector<8x16xf32>
      %32 = arith.addf %29, %31 : vector<8x16xf32>
      %c0_29 = arith.constant 0 : index
      %c0_30 = arith.constant 0 : index
      %33 = vector.load %arg7[%c0_29, %c0_30] : memref<8x16xf32, #tpu.memory_space<vmem>>, vector<8x16xf32>
      tpu.vector_store %arg7[%c0_29, %c0_30], %32 {strides = array<i32>} : memref<8x16xf32, #tpu.memory_space<vmem>>, vector<8x16xf32>,
    } else {
    }
    return
  }
  func.func @transform_0(%arg0: i32, %arg1: i32) -> (i32, i32, i32) {
    %c0_i32 = arith.constant 0 : i32
    %c0_i32_0 = arith.constant 0 : i32
    return %arg0, %arg1, %c0_i32 : i32, i32, i32
  }
  func.func @transform_1(%arg0: i32, %arg1: i32) -> (i32, i32, i32) {
    %c0_i32 = arith.constant 0 : i32
    %c0_i32_0 = arith.constant 0 : i32
    return %arg0, %arg1, %c0_i32 : i32, i32, i32
  }
  func.func @transform_2(%arg0: i32, %arg1: i32) -> (i32, i32) {
    %c0_i32 = arith.constant 0 : i32
    %c0_i32_0 = arith.constant 0 : i32
    %c0_i32_1 = arith.constant 0 : i32
    return %c0_i32, %c0_i32_0 : i32, i32
  }
  func.func @transform_3(%arg0: i32, %arg1: i32) -> (i32, i32) {
    %c0_i32 = arith.constant 0 : i32
    %c0_i32_0 = arith.constant 0 : i32
    %c0_i32_1 = arith.constant 0 : i32
    return %c0_i32, %c0_i32_0 : i32, i32
  }
  func.func @transform_4(%arg0: i32, %arg1: i32) -> (i32, i32) {
    %c0_i32 = arith.constant 0 : i32
    %c0_i32_0 = arith.constant 0 : i32
    %c0_i32_1 = arith.constant 0 : i32
    return %c0_i32, %c0_i32_0 : i32, i32
  }
  func.func @transform_5(%arg0: i32, %arg1: i32) -> (i32, i32) {
    %c0_i32 = arith.constant 0 : i32
    %c0_i32_0 = arith.constant 0 : i32
    return %arg0, %c0_i32 : i32, i32
  }
}

</mosaic_0001>

<bundles_post_ra>
// kernel: bert_pool_forward.1
= control target key start
LH: loop header
LB: loop body
LE: loop exit
PB: predicated region body
PF: predicated region fallthrough
CT: control target
= control target key end

     0   :  { %v590_v0 = vmov 0   ;;  %v591_v13 = vmov 1   ;;  %vm24_vm0 = vcmask 261120   ;;  %v592_v18 = vmov -1e+30   ;;  %s735_s1 = inlined_call_operand.vmem [shape: bf16[8,8,2], index: 1, kind: input, shape index: {}]   ;;  %s736_s3 = inlined_call_operand.vmem [shape: f32[32,16], index: 3, kind: input, shape index: {}]   ;;  %s737_s2 = inlined_call_operand.vmem [shape: f32[32,16], index: 2, kind: input, shape index: {}]   ;;  %s738_s0 = inlined_call_operand.vmem [shape: f32[8,8,32], index: 0, kind: input, shape index: {}]   ;;  %s739_s4 = inlined_call_operand.vmem [shape: f32[1,16], index: 4, kind: input, shape index: {}]   ;;  %s740_s5 = inlined_call_operand.vmem [shape: f32[8,16], index: 5, kind: output, shape index: {}]  }
   0x1   :  { %541 = vset.pattern.permute.xlu1 %v590_v0  ;;  %529 = vset.pattern.permute.xlu0 %v590_v0  ;;  %v489_v1 = vld [vmem:[%s735_s1 + $0x8] sm:$0xff]   ;;  %v474_v2 = vld [vmem:[%s735_s1] sm:$0xff]   ;;  %v490_v9 = vld [vmem:[%s735_s1 + $0x10] sm:$0xff]   ;;  %26 = vst.msk [vmem:[#allocation3] sm:$0xff] %vm24_vm0, %v592_v18  ;;  %v593_v19 = vmov 0.0   ;;  %vm594_vm1 = vmmov 0  }
   0x2   :  { %v479_v3 = vunpack.c.l.bf16 %v489_v1  ;;  %v480_v4 = vunpack.c.h.bf16 %v489_v1  ;;  %v475_v5 = vunpack.c.l.bf16 %v474_v2  ;;  %v476_v6 = vunpack.c.h.bf16 %v474_v2  ;;  %v491_v12 = vld [vmem:[%s735_s1 + $0x18] sm:$0xff]   ;;  %25 = vst.msk [vmem:[#allocation2] sm:$0xff] %vm24_vm0, %v592_v18  ;;  %502 = vmatprep.subr.mxu0 %v593_v19  ;;  %513 = vmatprep.subr.mxu1 %v593_v19  ;;  %v308_v22 = vld [vmem:[%s736_s3 + $0x10] sm:$0xff]  ;;  %v307_v24 = vld [vmem:[%s736_s3 + $0x8] sm:$0xff] }
   0x3   :  { %v483_v10 = vunpack.c.l.bf16 %v490_v9  ;;  %v484_v11 = vunpack.c.h.bf16 %v490_v9  ;;  %v487_v15 = vunpack.c.l.bf16 %v491_v12  ;;  %v488_v16 = vunpack.c.h.bf16 %v491_v12  ;;  %v309_v20 = vld [vmem:[%s736_s3 + $0x18] sm:$0xff]  ;;  %v303_v23 = vld [vmem:[%s737_s2 + $0x10] sm:$0xff]  ;;  %v302_v25 = vld [vmem:[%s737_s2 + $0x8] sm:$0xff]  ;;  %510 = vmatprep.mubr.msk.f32.mxu0 %vm594_vm1, %v593_v19  ;;  %521 = vmatprep.mubr.msk.f32.mxu1 %vm594_vm1, %v593_v19 }
   0x4   :  { %v542_v7 = vpack.i.bf16 %v480_v4, %v479_v3  ;;  %v530_v8 = vpack.i.bf16 %v476_v6, %v475_v5  ;;  %503 = vmatpush3.msra.mxu0 %v309_v20  ;;  %v304_v21 = vld [vmem:[%s737_s2 + $0x18] sm:$0xff]  ;;  %v306_v26 = vld [vmem:[%s736_s3] sm:$0xff]  ;;  %v29_v28 = vld [vmem:[%s738_s0 + $0x10] sm:$0xff]  ;;  %vm165_vm2 = vcmask 1041409   ;;  %vm167_vm3 = vcmask 1042434  }
   0x5   :  { %v559_v14 = vpack.i.bf16 %v484_v11, %v483_v10  ;;  %v569_v17 = vpack.i.bf16 %v488_v16, %v487_v15  ;;  %504 = vmatprep.subr.mxu0 %v593_v19  ;;  %514 = vmatpush3.msra.mxu1 %v304_v21  ;;  %v301_v27 = vld [vmem:[%s737_s2] sm:$0xff]  ;;  %v30_v30 = vld [vmem:[%s738_s0 + $0x18] sm:$0xff]  ;;  %v28_v33 = vld [vmem:[%s738_s0 + $0x8] sm:$0xff]  ;;  %vm169_vm4 = vcmask 1043459   ;;  %vm171_vm5 = vcmask 1044484  }
   0x6   :  { %543 = vperm.xlu1 %541, %v542_v7   ;;  %531 = vperm.xlu0 %529, %v530_v8   ;;  %v27_v32 = vld [vmem:[%s738_s0] sm:$0xff]  ;;  %vm173_vm6 = vcmask 1045509   ;;  %vm175_vm7 = vcmask 1046534   ;;  %vm177_vm8 = vcmask 1047559   ;;  %vm464_vm9 = vcmask 130048  }
   0x7   :  { %505 = vmatpush3.msra.mxu0 %v308_v22  ;;  %515 = vmatprep.subr.mxu1 %v593_v19  ;;  %v31_v16 = vld [vmem:[%s738_s0 + $0x20] sm:$0xff] }
   0x8   :  { %506 = vmatprep.subr.mxu0 %v593_v19  ;;  %516 = vmatpush3.msra.mxu1 %v303_v23 }
   0x9   :  { %507 = vmatpush3.msra.mxu0 %v307_v24  ;;  %517 = vmatprep.subr.mxu1 %v593_v19 }
   0xa   :  { %547 = vset.pattern.permute.xlu1 %v591_v13  ;;  %535 = vset.pattern.permute.xlu0 %v591_v13 }
   0xb   :  { %549 = vperm.xlu1 %547, %v542_v7   ;;  %537 = vperm.xlu0 %535, %v530_v8  }
   0xc   :  { %508 = vmatprep.subr.mxu0 %v593_v19  ;;  %518 = vmatpush3.msra.mxu1 %v302_v25 }
   0xd   :  { %509 = vmatpush3.msra.mxu0 %v306_v26  ;;  %519 = vmatprep.subr.mxu1 %v593_v19 }
   0xe   :  { %520 = vmatpush3.msra.mxu1 %v301_v27 }
   0xf   :  { %553 = vset.pattern.permute.xlu1 %v590_v0  ;;  %560 = vperm.xlu0 %535, %v559_v14  }
  0x10   :  { %555 = vperm.xlu1 %553, %v559_v14  }
  0x13   :  { %570 = vperm.xlu0 %535, %v569_v17  }
  0x14   :  { %565 = vperm.xlu1 %553, %v569_v17   ;;  %v32_v17 = vld [vmem:[%s738_s0 + $0x28] sm:$0xff] }
  0x81   :  { %v544_v29 = vpop.permute.xlu1 %543  ;;  %v532_v31 = vpop.permute.xlu0 %531 }
  0x82   :  { %v574_v34 = vadd.low.f32.bf16 %v29_v28, %v544_v29  ;;  %v575_v35 = vadd.high.f32.bf16 %v30_v30, %v544_v29  ;;  %v576_v36 = vadd.low.f32.bf16 %v27_v32, %v532_v31  ;;  %v577_v37 = vadd.high.f32.bf16 %v28_v33, %v532_v31 }
  0x84   :  { %v115_v38 = vsel %vm24_vm0, %v574_v34, -inf  ;;  %v122_v39 = vsel %vm24_vm0, %v575_v35, -inf  ;;  %v101_v40 = vsel %vm24_vm0, %v576_v36, -inf  ;;  %v108_v41 = vsel %vm24_vm0, %v577_v37, -inf }
  0x85   :  { %v116_v44 = vrot.slane %v115_v38, 4  ;;  %v123_v45 = vrot.slane %v122_v39, 4  ;;  %v102_v46 = vrot.slane %v101_v40, 4  ;;  %v109_v47 = vrot.slane %v108_v41, 4 }
  0x86   :  { %v550_v42 = vpop.permute.xlu1 %549  ;;  %v538_v43 = vpop.permute.xlu0 %537 }
  0x87   :  { %v117_v48 = vmax.f32 %v115_v38, %v116_v44  ;;  %v103_v49 = vmax.f32 %v101_v40, %v102_v46  ;;  %v110_v50 = vmax.f32 %v108_v41, %v109_v47  ;;  %v578_v51 = vadd.low.f32.bf16 %v29_v28, %v550_v42  ;;  %v33_v47 = vld [vmem:[%s738_s0 + $0x30] sm:$0xff] }
  0x88   :  { %v579_v52 = vadd.high.f32.bf16 %v30_v30, %v550_v42  ;;  %v580_v53 = vadd.low.f32.bf16 %v27_v32, %v538_v43  ;;  %v581_v54 = vadd.high.f32.bf16 %v28_v33, %v538_v43  ;;  %v124_v56 = vmax.f32 %v122_v39, %v123_v45 }
  0x89   :  { %v118_v55 = vrot.slane %v117_v48, 2  ;;  %v104_v57 = vrot.slane %v103_v49, 2  ;;  %v237_v58 = vsel %vm24_vm0, %v578_v51, -inf  ;;  %v111_v62 = vrot.slane %v110_v50, 2 }
  0x8a   :  { %v244_v59 = vsel %vm24_vm0, %v579_v52, -inf  ;;  %v223_v60 = vsel %vm24_vm0, %v580_v53, -inf  ;;  %v230_v61 = vsel %vm24_vm0, %v581_v54, -inf  ;;  %v238_v63 = vrot.slane %v237_v58, 4  ;;  %v561_v9 = vpop.permute.xlu0 %560 }
  0x8b   :  { %v245_v0 = vrot.slane %v244_v59, 4  ;;  %v224_v1 = vrot.slane %v223_v60, 4  ;;  %v231_v2 = vrot.slane %v230_v61, 4  ;;  %v683_v3 = vmax.f32 %v117_v48, %v118_v55  ;;  %v556_v10 = vpop.permute.xlu1 %555  ;;  %v34_v48 = vld [vmem:[%s738_s0 + $0x38] sm:$0xff] }
  0x8c   :  { %v125_v4 = vrot.slane %v124_v56, 2  ;;  %v105_v5 = vmax.f32 %v103_v49, %v104_v57  ;;  %v239_v6 = vmax.f32 %v237_v58, %v238_v63  ;;  %v112_v11 = vmax.f32 %v110_v50, %v111_v62 }
  0x8d   :  { %v225_v7 = vmax.f32 %v223_v60, %v224_v1  ;;  %v232_v8 = vmax.f32 %v230_v61, %v231_v2  ;;  %v246_v13 = vmax.f32 %v244_v59, %v245_v0  ;;  %v120_v19 = vrot.slane %v683_v3, 1 }
  0x8e   :  { %v240_v12 = vrot.slane %v239_v6, 2  ;;  %v691_v18 = vmax.f32 %v124_v56, %v125_v4  ;;  %v106_v20 = vrot.slane %v105_v5, 1  ;;  %v582_v24 = vadd.low.f32.bf16 %v31_v16, %v561_v9  ;;  %v571_v38 = vpop.permute.xlu0 %570 }
  0x8f   :  { %v226_v14 = vrot.slane %v225_v7, 2  ;;  %v233_v15 = vrot.slane %v232_v8, 2  ;;  %v583_v25 = vadd.high.f32.bf16 %v32_v17, %v561_v9  ;;  %v113_v26 = vrot.slane %v112_v11, 1  ;;  %v566_v51 = vpop.permute.xlu1 %565 }
  0x90   :  { %v241_v21 = vmax.f32 %v239_v6, %v240_v12  ;;  %v247_v27 = vrot.slane %v246_v13, 2  ;;  %v584_v29 = vadd.high.f32.bf16 %v32_v17, %v556_v10  ;;  %v251_v31 = vsel %vm24_vm0, %v582_v24, -inf }
  0x91   :  { %v227_v22 = vmax.f32 %v225_v7, %v226_v14  ;;  %v234_v23 = vmax.f32 %v232_v8, %v233_v15  ;;  %v258_v32 = vsel %vm24_vm0, %v583_v25, -inf  ;;  %v585_v33 = vadd.low.f32.bf16 %v31_v16, %v556_v10 }
  0x92   :  { %v107_v34 = vmax.f32 %v105_v5, %v106_v20  ;;  %v242_v35 = vrot.slane %v241_v21, 1  ;;  %v252_v37 = vrot.slane %v251_v31, 4  ;;  %v259_v40 = vrot.slane %v258_v32, 4 }
  0x93   :  { %v228_v28 = vrot.slane %v227_v22, 1  ;;  %v235_v30 = vrot.slane %v234_v23, 1  ;;  %v129_v41 = vsel %vm24_vm0, %v585_v33, -inf  ;;  %v136_v42 = vsel %vm24_vm0, %v584_v29, -inf }
  0x94   :  { %v248_v43 = vmax.f32 %v246_v13, %v247_v27  ;;  %v253_v44 = vmax.f32 %v251_v31, %v252_v37  ;;  %v130_v45 = vrot.slane %v129_v41, 4  ;;  %v137_v46 = vrot.slane %v136_v42, 4 }
  0x95   :  { %v229_v36 = vmax.f32 %v227_v22, %v228_v28  ;;  %v236_v39 = vmax.f32 %v234_v23, %v235_v30  ;;  %v114_v49 = vmax.f32 %v112_v11, %v113_v26  ;;  %v260_v50 = vmax.f32 %v258_v32, %v259_v40 }
  0x96   :  { %v243_v52 = vmax.f32 %v241_v21, %v242_v35  ;;  %v254_v53 = vrot.slane %v253_v44, 2  ;;  %v131_v54 = vmax.f32 %v129_v41, %v130_v45  ;;  %v138_v55 = vmax.f32 %v136_v42, %v137_v46 }
  0x97   :  { %v287_v56 = vsel %vm165_vm2, %v236_v39, %v229_v36  ;;  %v261_v57 = vrot.slane %v260_v50, 2  ;;  %v586_v58 = vadd.low.f32.bf16 %v33_v47, %v571_v38  ;;  %v587_v59 = vadd.high.f32.bf16 %v34_v48, %v571_v38 }
  0x98   :  { %v249_v60 = vrot.slane %v248_v43, 1  ;;  %v255_v61 = vmax.f32 %v253_v44, %v254_v53  ;;  %v132_v62 = vrot.slane %v131_v54, 2  ;;  %v288_v2 = vsel %vm167_vm3, %v243_v52, %v287_v56  ;;  %v182_v44 = vld [vmem:[#allocation3] sm:$0xff] }
  0x99   :  { %v262_v63 = vmax.f32 %v260_v50, %v261_v57  ;;  %v265_v0 = vsel %vm24_vm0, %v586_v58, -inf  ;;  %v272_v1 = vsel %vm24_vm0, %v587_v59, -inf  ;;  %v139_v5 = vrot.slane %v138_v55, 2  ;;  %v51_v58 = vld [vmem:[#allocation2] sm:$0xff] }
  0x9a   :  { %v256_v4 = vrot.slane %v255_v61, 1  ;;  %v266_v6 = vrot.slane %v265_v0, 4  ;;  %v133_v7 = vmax.f32 %v131_v54, %v132_v62  ;;  %v273_v8 = vrot.slane %v272_v1, 4 }
  0x9b   :  { %v588_v9 = vadd.low.f32.bf16 %v33_v47, %v566_v51  ;;  %v589_v10 = vadd.high.f32.bf16 %v34_v48, %v566_v51  ;;  %v121_v11 = vmax.f32 %v683_v3, %v120_v19  ;;  %v166_v12 = vsel %vm165_vm2, %v114_v49, %v107_v34 }
  0x9c   :  { %v250_v13 = vmax.f32 %v248_v43, %v249_v60  ;;  %v267_v14 = vmax.f32 %v265_v0, %v266_v6  ;;  %v263_v15 = vrot.slane %v262_v63, 1  ;;  %v274_v16 = vmax.f32 %v272_v1, %v273_v8 }
  0x9d   :  { %v143_v17 = vsel %vm24_vm0, %v588_v9, -inf  ;;  %v150_v20 = vsel %vm24_vm0, %v589_v10, -inf  ;;  %v257_v21 = vmax.f32 %v255_v61, %v256_v4  ;;  %v140_v23 = vmax.f32 %v138_v55, %v139_v5  ;;  %v472_v4 = vld [vmem:[%s739_s4] ss:$0 sm:$0xff] }
  0x9e   :  { %v289_v22 = vsel %vm169_vm4, %v250_v13, %v288_v2  ;;  %v268_v24 = vrot.slane %v267_v14, 2  ;;  %v134_v25 = vrot.slane %v133_v7, 1  ;;  %v275_v26 = vrot.slane %v274_v16, 2 }
  0x9f   :  { %v144_v27 = vrot.slane %v143_v17, 4  ;;  %v151_v28 = vrot.slane %v150_v20, 4  ;;  %v127_v3 = vrot.slane %v691_v18, 1  ;;  %v264_v29 = vmax.f32 %v262_v63, %v263_v15 }
  0xa0   :  { %v269_v19 = vmax.f32 %v267_v14, %v268_v24  ;;  %v276_v30 = vmax.f32 %v274_v16, %v275_v26  ;;  %v168_v33 = vsel %vm167_vm3, %v121_v11, %v166_v12  ;;  %v290_v34 = vsel %vm171_vm5, %v257_v21, %v289_v22 }
  0xa1   :  { %v145_v31 = vmax.f32 %v143_v17, %v144_v27  ;;  %v152_v32 = vmax.f32 %v150_v20, %v151_v28  ;;  %v141_v35 = vrot.slane %v140_v23, 1  ;;  %v135_v37 = vmax.f32 %v133_v7, %v134_v25 }
  0xa2   :  { %v270_v36 = vrot.slane %v269_v19, 1  ;;  %v277_v38 = vrot.slane %v276_v30, 1  ;;  %v128_v41 = vmax.f32 %v691_v18, %v127_v3  ;;  %v291_v43 = vsel %vm173_vm6, %v264_v29, %v290_v34 }
  0xa3   :  { %v146_v39 = vrot.slane %v145_v31, 2  ;;  %v153_v40 = vrot.slane %v152_v32, 2  ;;  %v142_v48 = vmax.f32 %v140_v23, %v141_v35 }
  0xa4   :  { %v271_v42 = vmax.f32 %v269_v19, %v270_v36  ;;  %v278_v45 = vmax.f32 %v276_v30, %v277_v38  ;;  %v170_v49 = vsel %vm169_vm4, %v128_v41, %v168_v33 }
  0xa5   :  { %v147_v46 = vmax.f32 %v145_v31, %v146_v39  ;;  %v154_v47 = vmax.f32 %v152_v32, %v153_v40  ;;  %v172_v51 = vsel %vm171_vm5, %v135_v37, %v170_v49 }
  0xa6   :  { %v292_v50 = vsel %vm175_vm7, %v271_v42, %v291_v43  ;;  %v174_v57 = vsel %vm173_vm6, %v142_v48, %v172_v51 }
  0xa7   :  { %v293_v52 = vsel %vm177_vm8, %v278_v45, %v292_v50  ;;  %v148_v53 = vrot.slane %v147_v46, 1  ;;  %v155_v54 = vrot.slane %v154_v47, 1 }
  0xa8   :  { %v295_v18 = vmax.f32 %v182_v44, %v293_v52 }
  0xa9   :  { %v149_v55 = vmax.f32 %v147_v46, %v148_v53  ;;  %v156_v56 = vmax.f32 %v154_v47, %v155_v54 }
  0xaa   :  { %296 = vst.msk [vmem:[#allocation3] sm:$0xff] %vm24_vm0, %v295_v18 }
  0xab   :  { %v176_v59 = vsel %vm175_vm7, %v149_v55, %v174_v57 }
  0xac   :  { %v178_v60 = vsel %vm177_vm8, %v156_v56, %v176_v59 }
  0xad   :  { %v180_v61 = vmax.f32 %v51_v58, %v178_v60 }
  0xaf   :  { %181 = vst.msk [vmem:[#allocation2] sm:$0xff] %vm24_vm0, %v180_v61 }
  0xb1   :  { %v305_v62 = vld [vmem:[#allocation3] sm:$0xff] }
  0xb2   :  { %511 = vmatmul.mubr.msk.f32.vlgmr.msra.gmra.mxu0 %vm24_vm0, %v305_v62 }
  0xb6   :  { %v300_v63 = vld [vmem:[#allocation2] sm:$0xff] }
  0xb7   :  { %522 = vmatmul.mubr.msk.f32.vlgmr.msra.gmra.mxu1 %vm24_vm0, %v300_v63 }
 0x172   :  { %v379_v0 = vpop.f32.mrf.mxu0 }
 0x174   :  { %v512_v1 = vpop.f32.mrf.mxu0 }
 0x177   :  { %v452_v2 = vpop.f32.mrf.mxu1 }
 0x178   :  { %v453_v5 = vadd.f32 %v452_v2, %v379_v0 }
 0x179   :  { %v523_v6 = vpop.f32.mrf.mxu1 }
 0x17a   :  { %v463_v7 = vadd.f32 %v472_v4, %v453_v5 }
 0x17c   :  { %465 = vst.msk [vmem:[%s740_s5] sm:$0xff] %vm464_vm9, %v463_v7 }

</bundles_post_ra>
